<compile_context>
chip_gen: v7x
topology: tpu7x:2x2x1
jax: 0.10.0
libtpu: 0.0.40
codegen_flags: <defaults>
</compile_context>

<pallas_src>
import functools

import jax
import jax.numpy as jnp
import numpy as np
from jax import lax
from jax.experimental import pallas as pl
from jax.experimental.pallas import tpu as pltpu

GAMMA = 2.0     # statically 2.0 -> applied as an explicit square (no pow)
ALPHA = 0.25

LANES = 128        # vreg lane width
CHUNK_ROWS = 512   # in-kernel compute chunk: bounds elementwise temporaries


def _cdiv(a, b):
    return -(-a // b)


def _round_up(x, m):
    return ((x + m - 1) // m) * m


def _chip_defaults():
    """Returns (num_cores, core_axis_semantics, max_row_tile) for this TPU."""
    kind = ""
    try:
        kind = jax.devices()[0].device_kind.lower()
    except Exception:
        pass
    if "v7" in kind:
        # 2 TensorCores/chip, ~3.2 TB/s HBM: big tiles + true core-parallel split.
        return 2, getattr(pltpu, "CORE_PARALLEL", pltpu.PARALLEL), 8192
    if "v6" in kind:
        return 1, pltpu.ARBITRARY, 4096
    if "v5p" in kind or "v4" in kind:
        # Megacore chips: 2 TCs fused per device; "parallel" shards the axis.
        return 2, pltpu.PARALLEL, 4096
    # v5e / unknown: 1 TensorCore, 16 MiB default scoped VMEM -> conservative.
    return 1, pltpu.ARBITRARY, 2048


def _focal_loss_kernel(logits_ref, targets_ref, out_ref, *,
                       steps, num_blocks, chunk, n_chunks,
                       rows_in_last, last_row_lanes,
                       last_tile_ragged, has_skip_tiles):
    c = pl.program_id(0)     # core-split axis
    s = pl.program_id(1)     # sequential reduction axis
    tile_idx = c * steps + s

    @pl.when(s == 0)
    def _():
        out_ref[...] = jnp.zeros((8, LANES), jnp.float32)

    def tile_sum(masked):
        """Focal-loss sum over this tile, folded to an (8, 128) partial."""
        def chunk_fn(i, acc):
            start = i * chunk
            if not isinstance(start, int):
                start = pl.multiple_of(start, chunk)
            x = logits_ref[pl.ds(start, chunk), :].astype(jnp.float32)
            t = targets_ref[pl.ds(start, chunk), :].astype(jnp.float32)
            # Numerically stable BCE-with-logits
            # (== F.binary_cross_entropy_with_logits, any target in [0, 1]):
            #   bce = max(x, 0) - x*t + log1p(exp(-|x|))
            bce = jnp.maximum(x, 0.0) - x * t + jnp.log1p(jnp.exp(-jnp.abs(x)))
            pt = jnp.exp(-bce)
            u = 1.0 - pt
            focal = ALPHA * (u * u) * bce   # gamma == 2.0 -> square, not pow
            if masked:
                # Validity for the single (last) ragged tile: garbage rows from
                # the Pallas partial block and zero-padded tail lanes are
                # dropped by the select (NaN/Inf cannot propagate).
                r = start + lax.broadcasted_iota(jnp.int32, (chunk, LANES), 0)
                l = lax.broadcasted_iota(jnp.int32, (chunk, LANES), 1)
                valid = (r < rows_in_last - 1) | (
                    (r == rows_in_last - 1) & (l < last_row_lanes))
                focal = jnp.where(valid, focal, 0.0)
            # (chunk, 128) -> (8, 128): pure elementwise vreg adds (VPU only).
            return acc + focal.reshape(chunk // 8, 8, LANES).sum(axis=0)

        zero = jnp.zeros((8, LANES), jnp.float32)
        if n_chunks == 1:
            return chunk_fn(0, zero)
        return lax.fori_loop(0, n_chunks, chunk_fn, zero)

    clean_tiles = num_blocks - 1 if last_tile_ragged else num_blocks

    if last_tile_ragged or has_skip_tiles:
        @pl.when(tile_idx < clean_tiles)
        def _():
            out_ref[...] += tile_sum(False)

        if last_tile_ragged:
            @pl.when(tile_idx == num_blocks - 1)
            def _():
                out_ref[...] += tile_sum(True)
        # tile_idx >= num_blocks: duplicated (clamped) tile produced by rounding
        # the block count up to the core split -> contributes nothing.
    else:
        out_ref[...] += tile_sum(False)


def binary_focal_loss(logits, targets, *, max_row_tile=None, num_cores=None,
                      chunk_rows=CHUNK_ROWS):
    """Mean binary focal loss (gamma=2, alpha=0.25, use_logits=True)."""
    assert logits.shape == targets.shape
    n_elem = int(np.prod(logits.shape))

    auto_cores, auto_sem, auto_tile = _chip_defaults()
    if max_row_tile is None:
        max_row_tile = auto_tile
    if num_cores is None:
        num_cores, core_sem = auto_cores, auto_sem
    else:
        core_sem = pltpu.PARALLEL if num_cores > 1 else pltpu.ARBITRARY

    # No host-side dtype cast (the kernel upcasts bf16/int inputs) and no
    # whole-array padding: at most a <128-element tail pad for lane alignment.
    flat_logits = jnp.ravel(logits)
    flat_targets = jnp.ravel(targets)
    rem = n_elem % LANES
    if rem:
        flat_logits = jnp.pad(flat_logits, (0, LANES - rem))
        flat_targets = jnp.pad(flat_targets, (0, LANES - rem))
    rows = _cdiv(n_elem, LANES)
    last_row_lanes = rem if rem else LANES

    logits_2d = flat_logits.reshape(rows, LANES)
    targets_2d = flat_targets.reshape(rows, LANES)

    # Sub-32-bit dtypes pack along sublanes: keep row tile / chunk a multiple
    # of the packed sublane count of the narrowest input dtype.
    pack = 8
    for a in (logits_2d, targets_2d):
        pack = max(pack, 8 * max(1, 4 // max(1, a.dtype.itemsize)))
    chunk_rows = _round_up(chunk_rows, pack)

    row_tile = min(max_row_tile, _round_up(_cdiv(rows, num_cores), pack))
    if row_tile > chunk_rows:
        row_tile = _round_up(row_tile, chunk_rows)
        chunk = chunk_rows
    else:
        chunk = row_tile
    n_chunks = row_tile // chunk

    num_blocks = _cdiv(rows, row_tile)
    if num_blocks < num_cores:
        num_cores, core_sem = 1, pltpu.ARBITRARY
    steps = _cdiv(num_blocks, num_cores)

    last_tile_ragged = (rows % row_tile != 0) or (rem != 0)
    has_skip_tiles = num_cores * steps > num_blocks
    rows_in_last = rows - (num_blocks - 1) * row_tile

    in_spec = pl.BlockSpec(
        (row_tile, LANES),
        lambda c, s: (jnp.minimum(c * steps + s, num_blocks - 1), 0))

    kernel = functools.partial(
        _focal_loss_kernel,
        steps=steps, num_blocks=num_blocks, chunk=chunk, n_chunks=n_chunks,
        rows_in_last=rows_in_last, last_row_lanes=last_row_lanes,
        last_tile_ragged=last_tile_ragged, has_skip_tiles=has_skip_tiles)

    partials = pl.pallas_call(
        kernel,
        out_shape=jax.ShapeDtypeStruct((num_cores, 8, LANES), jnp.float32),
        grid_spec=pltpu.PrefetchScalarGridSpec(
            num_scalar_prefetch=0,
            grid=(num_cores, steps),
            in_specs=[in_spec, in_spec],
            out_specs=pl.BlockSpec((None, 8, LANES), lambda c, s: (c, 0, 0)),
        ),
        compiler_params=pltpu.CompilerParams(
            dimension_semantics=(core_sem, pltpu.ARBITRARY)),
    )(logits_2d, targets_2d)

    return jnp.sum(partials) * jnp.float32(1.0 / n_elem)


def _reference_focal_loss(logits, targets):
    x = logits.astype(jnp.float32)
    t = targets.astype(jnp.float32)
    bce = jnp.maximum(x, 0.0) - x * t + jnp.log1p(jnp.exp(-jnp.abs(x)))
    pt = jnp.exp(-bce)
    return jnp.mean(ALPHA * (1.0 - pt) ** GAMMA * bce)


def _check(loss, ref, name):
    np.testing.assert_allclose(np.asarray(loss), np.asarray(ref),
                               rtol=1e-5, atol=1e-6, err_msg=name)


if __name__ == "__main__":
    key = jax.random.PRNGKey(0)
    ks = jax.random.split(key, 12)

    # 1) NCHW-shaped, lane-aligned inputs (2*4*16*16 = 2048 elements).
    logits = jax.random.normal(ks[0], (2, 4, 16, 16), dtype=jnp.float32)
    targets = (jax.random.uniform(ks[1], (2, 4, 16, 16)) > 0.5).astype(jnp.float32)
    _check(jax.block_until_ready(binary_focal_loss(logits, targets)),
           _reference_focal_loss(logits, targets), "aligned f32")

    # 2) Ragged shape (462 elements): tail pad + in-kernel element mask.
    logits_r = jax.random.normal(ks[2], (2, 3, 7, 11), dtype=jnp.float32)
    targets_r = (jax.random.uniform(ks[3], (2, 3, 7, 11)) > 0.5).astype(jnp.float32)
    _check(jax.block_until_ready(binary_focal_loss(logits_r, targets_r)),
           _reference_focal_loss(logits_r, targets_r), "ragged f32")

    # 3) Multi-block + forced 2-way core split with an odd block count
    #    (exercises the clamped index map / skipped-tile path).
    logits_m = jax.random.normal(ks[4], (2, 5, 32, 32), dtype=jnp.float32)
    targets_m = (jax.random.uniform(ks[5], (2, 5, 32, 32)) > 0.5).astype(jnp.float32)
    _check(jax.block_until_ready(
               binary_focal_loss(logits_m, targets_m, max_row_tile=16, num_cores=2)),
           _reference_focal_loss(logits_m, targets_m), "multi-block 2-core")

    # 4) Multi-block with a ragged final tile (70*89 = 6230 elements).
    logits_g = jax.random.normal(ks[6], (1, 1, 70, 89), dtype=jnp.float32)
    targets_g = (jax.random.uniform(ks[7], (1, 1, 70, 89)) > 0.5).astype(jnp.float32)
    _check(jax.block_until_ready(
               binary_focal_loss(logits_g, targets_g, max_row_tile=16)),
           _reference_focal_loss(logits_g, targets_g), "multi-block ragged")

    # 5) bf16 inputs (half the HBM traffic); kernel upcasts in-VMEM.
    logits_b = jax.random.normal(ks[8], (2, 4, 16, 16), dtype=jnp.bfloat16)
    targets_b = (jax.random.uniform(ks[9], (2, 4, 16, 16)) > 0.5).astype(jnp.bfloat16)
    _check(jax.block_until_ready(binary_focal_loss(logits_b, targets_b)),
           _reference_focal_loss(logits_b, targets_b), "aligned bf16")

    # 6) Exercise the in-kernel multi-chunk fori_loop path at small size.
    logits_c = jax.random.normal(ks[10], (2, 4, 16, 16), dtype=jnp.float32)
    targets_c = (jax.random.uniform(ks[11], (2, 4, 16, 16)) > 0.5).astype(jnp.float32)
    _check(jax.block_until_ready(
               binary_focal_loss(logits_c, targets_c, max_row_tile=32, chunk_rows=8)),
           _reference_focal_loss(logits_c, targets_c), "multi-chunk inner loop")

    print("KERNEL_OK")
</pallas_src>

<mosaic_0001>
module attributes {stable_mosaic.version = 11 : i64} {
  func.func @_focal_loss_kernel(%arg0: i32, %arg1: i32, %arg2: memref<16x128xf32, #tpu.memory_space<vmem>>, %arg3: memref<16x128xf32, #tpu.memory_space<vmem>>, %arg4: memref<1x8x128xf32, #tpu.memory_space<vmem>>) attributes {dimension_semantics = [#tpu.dimension_semantics<arbitrary>, #tpu.dimension_semantics<arbitrary>], iteration_bounds = array<i64: 1, 1>, scalar_prefetch = 0 : i64, scratch_operands = 0 : i64, tpu.core_type = #tpu.core_type<tc>, window_params = [{transform_indices = @transform_0, window_bounds = array<i64: 16, 128>}, {transform_indices = @transform_1, window_bounds = array<i64: 16, 128>}, {transform_indices = @transform_2, window_bounds = array<i64: 1, 8, 128>}]} {
    %c0_i32 = arith.constant 0 : i32
    %0 = arith.cmpi eq, %arg1, %c0_i32 : i32
    %1 = arith.extui %0 : i1 to i32
    %c0_i32_0 = arith.constant 0 : i32
    %2 = arith.cmpi ne, %1, %c0_i32_0 : i32
    scf.if %2 {
      %cst_16 = arith.constant 0.000000e+00 : f32
      %34 = vector.broadcast %cst_16 : f32 to vector<8x128xf32>
      %c0_17 = arith.constant 0 : index
      %c0_18 = arith.constant 0 : index
      %c0_19 = arith.constant 0 : index
      %35 = vector.load %arg4[%c0_17, %c0_18, %c0_19] : memref<1x8x128xf32, #tpu.memory_space<vmem>>, vector<1x8x128xf32>
      %36 = vector.shape_cast %35 : vector<1x8x128xf32> to vector<8x128xf32>
      %37 = vector.shape_cast %34 : vector<8x128xf32> to vector<1x8x128xf32>
      tpu.vector_store %arg4[%c0_17, %c0_18, %c0_19], %37 {strides = array<i32>} : memref<1x8x128xf32, #tpu.memory_space<vmem>>, vector<1x8x128xf32>,
    } else {
    }
    %c0 = arith.constant 0 : index
    %c0_1 = arith.constant 0 : index
    %c0_2 = arith.constant 0 : index
    %3 = vector.load %arg4[%c0, %c0_1, %c0_2] : memref<1x8x128xf32, #tpu.memory_space<vmem>>, vector<1x8x128xf32>
    %4 = vector.shape_cast %3 : vector<1x8x128xf32> to vector<8x128xf32>
    %cst = arith.constant 0.000000e+00 : f32
    %5 = vector.broadcast %cst : f32 to vector<8x128xf32>
    %c0_3 = arith.constant 0 : index
    %c0_4 = arith.constant 0 : index
    %6 = vector.load %arg2[%c0_3, %c0_4] : memref<16x128xf32, #tpu.memory_space<vmem>>, vector<16x128xf32>
    %c0_5 = arith.constant 0 : index
    %c0_6 = arith.constant 0 : index
    %7 = vector.load %arg3[%c0_5, %c0_6] : memref<16x128xf32, #tpu.memory_space<vmem>>, vector<16x128xf32>
    %cst_7 = arith.constant 0.000000e+00 : f32
    %8 = vector.broadcast %cst_7 : f32 to vector<16x128xf32>
    %9 = arith.maximumf %6, %8 : vector<16x128xf32>
    %10 = arith.mulf %6, %7 : vector<16x128xf32>
    %11 = arith.subf %9, %10 : vector<16x128xf32>
    %12 = math.absf %6 : vector<16x128xf32>
    %cst_8 = arith.constant 0.000000e+00 : f32
    %13 = vector.broadcast %cst_8 : f32 to vector<16x128xf32>
    %14 = arith.subf %13, %12 : vector<16x128xf32>
    %15 = math.exp %14 : vector<16x128xf32>
    %16 = math.log1p %15 : vector<16x128xf32>
    %17 = arith.addf %11, %16 : vector<16x128xf32>
    %cst_9 = arith.constant 0.000000e+00 : f32
    %18 = vector.broadcast %cst_9 : f32 to vector<16x128xf32>
    %19 = arith.subf %18, %17 : vector<16x128xf32>
    %20 = math.exp %19 : vector<16x128xf32>
    %cst_10 = arith.constant 1.000000e+00 : f32
    %21 = vector.broadcast %cst_10 : f32 to vector<16x128xf32>
    %22 = arith.subf %21, %20 : vector<16x128xf32>
    %23 = arith.mulf %22, %22 : vector<16x128xf32>
    %cst_11 = arith.constant 2.500000e-01 : f32
    %24 = vector.broadcast %cst_11 : f32 to vector<16x128xf32>
    %25 = arith.mulf %24, %23 : vector<16x128xf32>
    %26 = arith.mulf %25, %17 : vector<16x128xf32>
    %27 = vector.shape_cast %26 : vector<16x128xf32> to vector<2x8x128xf32>
    %cst_12 = arith.constant dense<0.000000e+00> : vector<8x128xf32>
    %28 = vector.multi_reduction <add>, %27, %cst_12 [0] : vector<2x8x128xf32> to vector<8x128xf32>
    %29 = arith.addf %5, %28 : vector<8x128xf32>
    %30 = arith.addf %4, %29 : vector<8x128xf32>
    %c0_13 = arith.constant 0 : index
    %c0_14 = arith.constant 0 : index
    %c0_15 = arith.constant 0 : index
    %31 = vector.load %arg4[%c0_13, %c0_14, %c0_15] : memref<1x8x128xf32, #tpu.memory_space<vmem>>, vector<1x8x128xf32>
    %32 = vector.shape_cast %31 : vector<1x8x128xf32> to vector<8x128xf32>
    %33 = vector.shape_cast %30 : vector<8x128xf32> to vector<1x8x128xf32>
    tpu.vector_store %arg4[%c0_13, %c0_14, %c0_15], %33 {strides = array<i32>} : memref<1x8x128xf32, #tpu.memory_space<vmem>>, vector<1x8x128xf32>,
    return
  }
  func.func @transform_0(%arg0: i32, %arg1: i32) -> (i32, i32) {
    %c1_i32 = arith.constant 1 : i32
    %0 = arith.muli %arg0, %c1_i32 : i32
    %1 = arith.addi %0, %arg1 : i32
    %c0_i32 = arith.constant 0 : i32
    %2 = arith.minsi %1, %c0_i32 : i32
    %c0_i32_0 = arith.constant 0 : i32
    %c0_i32_1 = arith.constant 0 : i32
    return %2, %c0_i32_0 : i32, i32
  }
  func.func @transform_1(%arg0: i32, %arg1: i32) -> (i32, i32) {
    %c1_i32 = arith.constant 1 : i32
    %0 = arith.muli %arg0, %c1_i32 : i32
    %1 = arith.addi %0, %arg1 : i32
    %c0_i32 = arith.constant 0 : i32
    %2 = arith.minsi %1, %c0_i32 : i32
    %c0_i32_0 = arith.constant 0 : i32
    %c0_i32_1 = arith.constant 0 : i32
    return %2, %c0_i32_0 : i32, i32
  }
  func.func @transform_2(%arg0: i32, %arg1: i32) -> (i32, i32, i32) {
    %c0_i32 = arith.constant 0 : i32
    %c0_i32_0 = arith.constant 0 : i32
    %c0_i32_1 = arith.constant 0 : i32
    return %arg0, %c0_i32, %c0_i32_0 : i32, i32, i32
  }
}

</mosaic_0001>

<bundles_post_ra>
// kernel: tpu_custom_call.1
= control target key start
LH: loop header
LB: loop body
LE: loop exit
PB: predicated region body
PF: predicated region fallthrough
CT: control target
= control target key end

     0   :  { %7 = vsyncpa [#allocation3], 0  ;;  %s288_s0 = inlined_call_operand.hbm [shape: f32[16,128], index: 0, kind: input, shape index: {}]   ;;  %s289_s1 = inlined_call_operand.hbm [shape: f32[16,128], index: 1, kind: input, shape index: {}]   ;;  %s290_s2 = inlined_call_operand.hbm [shape: f32[1,8,128], index: 2, kind: output, shape index: {}]  }
   0x1   :  { %8 = vsyncpa [#allocation6], 0 }
   0x2   :  { %9 = vsyncpa [#allocation4], 0  ;;  %s232_s9 = smov [#allocation2]   ;;  %s160_s13 = scalar_lea.hbm %s288_s0, 256 }
   0x3   :  { %s21_s10 = sshll.u32 %s232_s9, 4  ;;  %p161_p0 = scmp.ne.s32.totalorder %s288_s0, %s160_s13  ;;  %s22_s10 = int_to_ptr.vmem [resolvable:$true] %s21_s10 }
   0x4   :  { %p164_p1 = scmp.lt.u32.totalorder %s160_s13, %s288_s0 }
   0x6   :  { %p166_p2 = pnand %p164_p1, %p161_p0 }
   0x8   :  { %169 = shalt.err (!%p166_p2)
}
   0x9   :  { %s170_s18 = scalar_lea.vmem %s22_s10, 256  ;;  %p175_p4 = scmp.lt.s32.totalorder %s22_s10, %s22_s10 }
   0xa   :  { %p171_p3 = scmp.ne.s32.totalorder %s22_s10, %s170_s18  ;;  %p176_p5 = scmp.lt.s32.totalorder %s170_s18, %s170_s18 }
   0xc   :  { %p177_p6 = por %p176_p5, %p175_p4 }
   0xe   :  { %p178_p7 = pnand %p177_p6, %p171_p3 }
  0x10   :  { %181 = shalt.err (!%p178_p7)
}
  0x11   :  { %s233_s19 = smov 128   ;;  %s234_s20 = smov 8  }
  0x12   :  { %27 = dma.hbm_to_vmem [thread:$0]  %s288_s0, 256, %s22_s10, [#allocation3], %s233_s19, %s233_s19, %s234_s20  }
  0x13   :  { %s235_s23 = smov [#allocation5]   ;;  %s182_s27 = scalar_lea.hbm %s289_s1, 256 }
  0x14   :  { %s39_s24 = sshll.u32 %s235_s23, 4  ;;  %p183_p8 = scmp.ne.s32.totalorder %s289_s1, %s182_s27  ;;  %s40_s24 = int_to_ptr.vmem [resolvable:$true] %s39_s24 }
  0x15   :  { %p186_p9 = scmp.lt.u32.totalorder %s182_s27, %s289_s1 }
  0x17   :  { %p188_p10 = pnand %p186_p9, %p183_p8 }
  0x19   :  { %191 = shalt.err (!%p188_p10)
}
  0x1a   :  { %s192_s4 = scalar_lea.vmem %s40_s24, 256  ;;  %p197_p12 = scmp.lt.s32.totalorder %s40_s24, %s40_s24 }
  0x1b   :  { %p193_p11 = scmp.ne.s32.totalorder %s40_s24, %s192_s4  ;;  %p198_p13 = scmp.lt.s32.totalorder %s192_s4, %s192_s4 }
  0x1d   :  { %p199_p0 = por %p198_p13, %p197_p12 }
  0x1f   :  { %p200_p1 = pnand %p199_p0, %p193_p11 }
  0x21   :  { %203 = shalt.err (!%p200_p1)
}
  0x22   :  { %45 = dma.hbm_to_vmem [thread:$0]  %s289_s1, 256, %s40_s24, [#allocation6], %s233_s19, %s233_s19, %s234_s20  }
  0x23   :  { %226 = dma.done.wait [#allocation3], 256  }
  0x24   :  { %227 = vsyncadd [#allocation3], 4294967040 }
  0x25   :  { %228 = dma.done.wait [#allocation6], 256  }
  0x26   :  { %229 = vsyncadd [#allocation6], 4294967040  ;;  %v66_v0 = vld [vmem:[#allocation2] sm:$0xff]  ;;  %v67_v1 = vld [vmem:[#allocation2 + $0x8] sm:$0xff]  ;;  %s236_s1 = smov [#allocation7]  }
  0x27   :  { %v76_v2 = vand.u32 2147483647, %v66_v0  ;;  %v77_v3 = vand.u32 2147483647, %v67_v1  ;;  %v68_v14 = vld [vmem:[#allocation5] sm:$0xff]  ;;  %v69_v15 = vld [vmem:[#allocation5 + $0x8] sm:$0xff] }
  0x28   :  { %v70_v17 = vmax.f32 %v66_v0, 0.0  ;;  %v72_v18 = vmul.f32 %v68_v14, %v66_v0  ;;  %v71_v21 = vmax.f32 %v67_v1, 0.0  ;;  %v73_v22 = vmul.f32 %v69_v15, %v67_v1  ;;  %s128_s6 = sshll.u32 %s236_s1, 4  ;;  %s129_s6 = int_to_ptr.vmem [resolvable:$true] %s128_s6 }
  0x29   :  { %v78_v4 = vsub.f32 0.0, %v76_v2  ;;  %v79_v5 = vsub.f32 0.0, %v77_v3  ;;  %s204_s7 = scalar_lea.vmem %s129_s6, 128  ;;  %p209_p3 = scmp.lt.s32.totalorder %s129_s6, %s129_s6 }
  0x2a   :  { %v74_v26 = vsub.f32 %v70_v17, %v72_v18  ;;  %v75_v29 = vsub.f32 %v71_v21, %v73_v22  ;;  %p205_p2 = scmp.ne.s32.totalorder %s129_s6, %s204_s7  ;;  %p210_p4 = scmp.lt.s32.totalorder %s204_s7, %s204_s7 }
  0x2b   :  { %v80_v6 = vmul.f32 1.442695, %v78_v4  ;;  %v82_v7 = vmul.f32 1.442695, %v79_v5 }
  0x2c   :  { %p211_p5 = por %p210_p4, %p209_p3 }
  0x2d   :  { %148 = vpow2.f32 %v80_v6 }
  0x2e   :  { %150 = vpow2.f32 %v82_v7  ;;  %p212_p6 = pnand %p211_p5, %p205_p2 }
  0x37   :  { %v149_v8 = vpop.eup %148 }
  0x38   :  { %v151_v9 = vpop.eup %150  ;;  %v84_v10 = vadd.f32 1.0, %v149_v8  ;;  %v87_v12 = vmul.f32 -0.5, %v149_v8  ;;  %v90_v19 = vand.u32 2147483647, %v149_v8 }
  0x39   :  { %v93_v11 = vadd.f32 1.0, %v151_v9  ;;  %v96_v13 = vmul.f32 -0.5, %v151_v9  ;;  %v99_v23 = vand.u32 2147483647, %v151_v9 }
  0x3a   :  { %152 = vlog2.f32 %v84_v10  ;;  %v88_v16 = vadd.f32 1.0, %v87_v12  ;;  %vm91_vm0 = vcmp.lt.f32.partialorder %v90_v19, 0.0004427343 }
  0x3b   :  { %154 = vlog2.f32 %v93_v11  ;;  %v97_v20 = vadd.f32 1.0, %v96_v13  ;;  %vm100_vm1 = vcmp.lt.f32.partialorder %v99_v23, 0.0004427343 }
  0x3c   :  { %v89_v24 = vmul.f32 %v149_v8, %v88_v16 }
  0x3d   :  { %v98_v27 = vmul.f32 %v151_v9, %v97_v20 }
  0x44   :  { %v153_v25 = vpop.eup %152 }
  0x45   :  { %v155_v28 = vpop.eup %154  ;;  %v86_v30 = vmul.f32 0.6931472, %v153_v25 }
  0x46   :  { %v95_v31 = vmul.f32 0.6931472, %v155_v28 }
  0x47   :  { %v92_v32 = vsel %vm91_vm0, %v89_v24, %v86_v30 }
  0x48   :  { %v101_v33 = vsel %vm100_vm1, %v98_v27, %v95_v31  ;;  %v102_v34 = vadd.f32 %v92_v32, %v74_v26 }
  0x49   :  { %v103_v35 = vadd.f32 %v101_v33, %v75_v29 }
  0x4a   :  { %v104_v36 = vsub.f32 0.0, %v102_v34 }
  0x4b   :  { %v105_v37 = vsub.f32 0.0, %v103_v35 }
  0x4c   :  { %v106_v38 = vmul.f32 1.442695, %v104_v36 }
  0x4d   :  { %v108_v39 = vmul.f32 1.442695, %v105_v37 }
  0x4e   :  { %156 = vpow2.f32 %v106_v38 }
  0x4f   :  { %158 = vpow2.f32 %v108_v39 }
  0x58   :  { %v157_v40 = vpop.eup %156 }
  0x59   :  { %v159_v41 = vpop.eup %158  ;;  %v110_v42 = vsub.f32 1.0, %v157_v40 }
  0x5a   :  { %v111_v43 = vsub.f32 1.0, %v159_v41 }
  0x5b   :  { %v112_v44 = vmul.f32 %v110_v42, %v110_v42 }
  0x5c   :  { %v113_v45 = vmul.f32 %v111_v43, %v111_v43 }
  0x5d   :  { %v114_v46 = vmul.f32 0.25, %v112_v44 }
  0x5e   :  { %v115_v47 = vmul.f32 0.25, %v113_v45 }
  0x5f   :  { %v116_v48 = vmul.f32 %v114_v46, %v102_v34 }
  0x60   :  { %v117_v49 = vmul.f32 %v115_v47, %v103_v35 }
  0x62   :  { %v118_v50 = vadd.f32 %v117_v49, %v116_v48 }
  0x64   :  { %121 = vst [vmem:[#allocation7] sm:$0xff] %v118_v50 }
  0x65   :  { %215 = shalt.err (!%p212_p6)
}
  0x66   :  { %s216_s10 = scalar_lea.hbm %s290_s2, 128 }
  0x67   :  { %p217_p7 = scmp.ne.s32.totalorder %s290_s2, %s216_s10  ;;  %p220_p8 = scmp.lt.u32.totalorder %s216_s10, %s290_s2 }
  0x69   :  { %p222_p9 = pnand %p220_p8, %p217_p7 }
  0x6b   :  { %225 = shalt.err (!%p222_p9)
}
  0x6c   :  { %131 = dma.vmem_to_hbm [thread:$0]  %s129_s6, 128, %s290_s2, [#allocation4]  }
  0x6d   :  { %230 = dma.done.wait [#allocation4], 128  }
  0x6e   :  { %231 = vsyncadd [#allocation4], 4294967168 }
  0x6f   :  { %135 = vsyncpa [#allocation3], 1 }
  0x70   :  { %136 = vsyncpa [#allocation6], 1 }
  0x71   :  { %137 = vsyncpa [#allocation4], 1 }

</bundles_post_ra>
